<compile_context>
chip_gen: v5e
topology: v5e:2x2
jax: 0.10.0
libtpu: 0.0.40
codegen_flags: <defaults>
</compile_context>

<pallas_src>
import functools

import jax
import jax.numpy as jnp
from jax.experimental import pallas as pl
from jax.experimental.pallas import tpu as pltpu


def _ce_kernel(n_total, tile_n, steps, logits_ref, labels_ref, o_ref, acc_ref):
    # logits_ref : (tile_n, C)   VMEM, input dtype (f32 or bf16)
    # labels_ref : (tile_n, 1)   VMEM int32
    # o_ref      : (8, 128)      VMEM f32, this split's partial-sum block
    # acc_ref    : (1, 1)        VMEM f32 scratch, running sum of per-row CE
    s = pl.program_id(0)          # split (parallel)
    t = pl.program_id(1)          # row-tile step within the split (arbitrary)

    @pl.when(t == 0)
    def _():
        acc_ref[...] = jnp.zeros_like(acc_ref)

    x = logits_ref[...]                      # (tn, C), input dtype
    lab = labels_ref[...]                    # (tn, 1) int32
    tn, c = x.shape

    # Row max in the input dtype (exact), promote the scalar-per-row only.
    m32 = jnp.max(x, axis=1, keepdims=True).astype(jnp.float32)      # (tn, 1)
    # exp/log in f32 (EUP); the promote is fused into the subtraction so no
    # persistent full f32 copy of the tile is forced for bf16 inputs.
    se = jnp.sum(jnp.exp(x.astype(jnp.float32) - m32), axis=1, keepdims=True)
    lse = m32 + jnp.log(se)                                           # (tn, 1)

    # logits[i, labels[i]] via one-hot select against a (1, C) lane iota
    # (broadcast compare; exact in the input dtype, one nonzero per row).
    col = jax.lax.broadcasted_iota(jnp.int32, (1, c), 1)
    picked = jnp.sum(
        jnp.where(col == lab, x, jnp.zeros((), x.dtype)),
        axis=1, keepdims=True).astype(jnp.float32)                    # (tn, 1)

    per_row = lse - picked                                            # (tn, 1)

    # Mask ragged tail rows and wrapped (duplicate) tiles by global row index.
    tile_idx = s * steps + t                 # unclamped logical tile index
    row = jax.lax.broadcasted_iota(jnp.int32, (tn, 1), 0) + tile_idx * tile_n
    per_row = jnp.where(row < n_total, per_row, 0.0)

    acc_ref[...] += jnp.sum(per_row, axis=0, keepdims=True)

    @pl.when(t == steps - 1)
    def _():
        o_ref[...] = jnp.broadcast_to(acc_ref[...], o_ref.shape)


def _choose_tile_n(n, c, itemsize):
    """Byte-budget tile chooser keyed to C / dtype.

    Per-row VMEM bytes while pipelined:
      2 x logits input buffer (double-buffered) + 1 x f32 working set for the
      exp pass + 2 x (tile_n, 1) int32 label block padded to 128 lanes.
    Targets ~24 MiB total (~6-8 MiB of logits per buffer), which is safe on
    every generation including v7x's 64 MiB physical VMEM per TensorCore.
    """
    # TODO(synk): for very large C (a single row of logits exceeding the VMEM
    # budget), add an inner "arbitrary" class axis with online (flash-style)
    # logsumexp so tile_n doesn't degenerate to the 8/16-row minimum.
    sub = 8 if itemsize >= 4 else 16
    per_row = 2 * c * itemsize + 4 * c + 2 * 128 * 4
    budget = 24 << 20
    tile = max(sub, (budget // per_row) // sub * sub)
    if tile >= n:
        return int(n)            # single tile covering the full batch
    return int(tile)


def ourloss_only_ce(features_front, logits, labels, mask=None, *, tile_n=None):
    """Mirrors OurlossonlyCE.forward: returns F.cross_entropy(logits, labels)."""
    del features_front, mask     # accepted for signature parity; unused by ref
    n, c = logits.shape
    itemsize = jnp.dtype(logits.dtype).itemsize
    if tile_n is None:
        tile_n = _choose_tile_n(n, c, itemsize)
    tile_n = int(tile_n)

    total_tiles = pl.cdiv(n, tile_n)
    num_splits = 2 if total_tiles >= 2 else 1   # v7x: one split per TensorCore
    steps = pl.cdiv(total_tiles, num_splits)

    labels2d = labels.astype(jnp.int32).reshape(n, 1)

    # Odd tile counts: the extra (s, t) iteration wraps to an in-range tile via
    # `%`; its rows are fully masked in-kernel (global row index >= N).
    def block_idx(s, t):
        return (s * steps + t) % total_tiles

    per_row_bytes = 2 * c * itemsize + 4 * c + 2 * 128 * 4
    vmem_limit = int(min(max(tile_n * per_row_bytes + (8 << 20), 32 << 20),
                         48 << 20))

    cost = pl.CostEstimate(
        flops=5 * n * c,
        transcendentals=n * c + n,
        bytes_accessed=n * c * itemsize + n * 4 + num_splits * 8 * 128 * 4,
    )

    out = pl.pallas_call(
        functools.partial(_ce_kernel, n, tile_n, steps),
        out_shape=jax.ShapeDtypeStruct((num_splits * 8, 128), jnp.float32),
        grid=(num_splits, steps),
        in_specs=[
            pl.BlockSpec((tile_n, c), lambda s, t: (block_idx(s, t), 0)),
            pl.BlockSpec((tile_n, 1), lambda s, t: (block_idx(s, t), 0)),
        ],
        out_specs=pl.BlockSpec((8, 128), lambda s, t: (s, 0)),
        scratch_shapes=[pltpu.VMEM((1, 1), jnp.float32)],
        compiler_params=pltpu.CompilerParams(
            dimension_semantics=("parallel", "arbitrary"),
            vmem_limit_bytes=vmem_limit),
        cost_estimate=cost,
    )(logits, labels2d)

    partials = out[0::8, 0]                  # one partial sum per split
    return jnp.sum(partials) / jnp.float32(n)


def ce_ref(logits, labels):
    x = logits.astype(jnp.float32)
    lse = jax.scipy.special.logsumexp(x, axis=1)
    picked = jnp.take_along_axis(x, labels[:, None].astype(jnp.int32), axis=1)[:, 0]
    return jnp.mean(lse - picked)


if __name__ == "__main__":
    key = jax.random.PRNGKey(0)

    # --- Primary (small shapes matching the module's forward signature). ---
    k1, k2, k3 = jax.random.split(key, 3)
    N, C, D = 8, 32, 16          # batch, num_class, (unused) feature dim
    features_front = jax.random.normal(k1, (N, D), dtype=jnp.float32)
    logits = jax.random.normal(k2, (N, C), dtype=jnp.float32)
    labels = jax.random.randint(k3, (N,), 0, C, dtype=jnp.int32)

    loss = jax.block_until_ready(ourloss_only_ce(features_front, logits, labels))
    ref = ce_ref(logits, labels)
    assert jnp.allclose(loss, ref, rtol=1e-5, atol=1e-5), (loss, ref)

    # --- Tiled / 2-split / ragged-tail / wrapped-tile path (f32). ---
    k4, k5 = jax.random.split(jax.random.PRNGKey(1), 2)
    N2, C2 = 300, 256            # 5 tiles of 64 rows -> 2 splits x 3 steps
    logits2 = jax.random.normal(k4, (N2, C2), dtype=jnp.float32)
    labels2 = jax.random.randint(k5, (N2,), 0, C2, dtype=jnp.int32)
    loss2 = jax.block_until_ready(
        ourloss_only_ce(None, logits2, labels2, tile_n=64))
    ref2 = ce_ref(logits2, labels2)
    assert jnp.allclose(loss2, ref2, rtol=1e-5, atol=1e-5), (loss2, ref2)

    # --- bf16 input path (no full f32 tile materialization). ---
    k6, k7 = jax.random.split(jax.random.PRNGKey(2), 2)
    N3, C3 = 200, 256            # 4 tiles of 64 rows -> 2 splits x 2 steps
    logits3 = jax.random.normal(k6, (N3, C3), dtype=jnp.float32).astype(jnp.bfloat16)
    labels3 = jax.random.randint(k7, (N3,), 0, C3, dtype=jnp.int32)
    loss3 = jax.block_until_ready(
        ourloss_only_ce(None, logits3, labels3, tile_n=64))
    ref3 = ce_ref(logits3, labels3)
    assert jnp.allclose(loss3, ref3, rtol=1e-3, atol=1e-3), (loss3, ref3)

    print("KERNEL_OK")
</pallas_src>

<mosaic_0001>
module attributes {stable_mosaic.version = 11 : i64} {
  func.func @_ce_kernel(%arg0: i32, %arg1: i32, %arg2: memref<8x32xf32, #tpu.memory_space<vmem>>, %arg3: memref<8x1xi32, #tpu.memory_space<vmem>>, %arg4: memref<8x128xf32, #tpu.memory_space<vmem>>, %arg5: memref<1x1xf32, #tpu.memory_space<vmem>>) attributes {dimension_semantics = [#tpu.dimension_semantics<parallel>, #tpu.dimension_semantics<arbitrary>], iteration_bounds = array<i64: 1, 1>, scalar_prefetch = 0 : i64, scratch_operands = 1 : i64, tpu.core_type = #tpu.core_type<tc>, window_params = [{transform_indices = @transform_0, window_bounds = array<i64: 8, 32>}, {transform_indices = @transform_1, window_bounds = array<i64: 8, 1>}, {transform_indices = @transform_2, window_bounds = array<i64: 8, 128>}]} {
    %c0_i32 = arith.constant 0 : i32
    %0 = arith.cmpi eq, %arg1, %c0_i32 : i32
    %1 = arith.extui %0 : i1 to i32
    %c0_i32_0 = arith.constant 0 : i32
    %2 = arith.cmpi ne, %1, %c0_i32_0 : i32
    scf.if %2 {
      %cst_16 = arith.constant 0.000000e+00 : f32
      %41 = vector.broadcast %cst_16 : f32 to vector<1x1xf32>
      %c0_17 = arith.constant 0 : index
      %c0_18 = arith.constant 0 : index
      %42 = vector.load %arg5[%c0_17, %c0_18] : memref<1x1xf32, #tpu.memory_space<vmem>>, vector<1x1xf32>
      tpu.vector_store %arg5[%c0_17, %c0_18], %41 {strides = array<i32>} : memref<1x1xf32, #tpu.memory_space<vmem>>, vector<1x1xf32>,
    } else {
    }
    %c0 = arith.constant 0 : index
    %c0_1 = arith.constant 0 : index
    %3 = vector.load %arg2[%c0, %c0_1] : memref<8x32xf32, #tpu.memory_space<vmem>>, vector<8x32xf32>
    %c0_2 = arith.constant 0 : index
    %c0_3 = arith.constant 0 : index
    %4 = vector.load %arg3[%c0_2, %c0_3] : memref<8x1xi32, #tpu.memory_space<vmem>>, vector<8x1xi32>
    %cst = arith.constant dense<0xFF800000> : vector<8xf32>
    %5 = vector.multi_reduction <maximumf>, %3, %cst [1] : vector<8x32xf32> to vector<8xf32>
    %6 = vector.shape_cast %5 : vector<8xf32> to vector<8x1xf32>
    %7 = vector.broadcast %6 : vector<8x1xf32> to vector<8x32xf32>
    %8 = arith.subf %3, %7 : vector<8x32xf32>
    %9 = math.exp %8 : vector<8x32xf32>
    %cst_4 = arith.constant dense<0.000000e+00> : vector<8xf32>
    %10 = vector.multi_reduction <add>, %9, %cst_4 [1] : vector<8x32xf32> to vector<8xf32>
    %11 = vector.shape_cast %10 : vector<8xf32> to vector<8x1xf32>
    %12 = math.log %11 : vector<8x1xf32>
    %13 = arith.addf %6, %12 : vector<8x1xf32>
    %14 = tpu.iota {dimensions = array<i32: 1>} : vector<1x32xi32>
    %15 = vector.broadcast %14 : vector<1x32xi32> to vector<8x32xi32>
    %16 = vector.broadcast %4 : vector<8x1xi32> to vector<8x32xi32>
    %17 = arith.cmpi eq, %15, %16 : vector<8x32xi32>
    %cst_5 = arith.constant 0.000000e+00 : f32
    %18 = vector.broadcast %cst_5 : f32 to vector<8x32xf32>
    %19 = arith.select %17, %3, %18 : vector<8x32xi1>, vector<8x32xf32>
    %cst_6 = arith.constant dense<0.000000e+00> : vector<8xf32>
    %20 = vector.multi_reduction <add>, %19, %cst_6 [1] : vector<8x32xf32> to vector<8xf32>
    %21 = vector.shape_cast %20 : vector<8xf32> to vector<8x1xf32>
    %22 = arith.subf %13, %21 : vector<8x1xf32>
    %c1_i32 = arith.constant 1 : i32
    %23 = arith.muli %arg0, %c1_i32 : i32
    %24 = arith.addi %23, %arg1 : i32
    %25 = tpu.iota {dimensions = array<i32: 0>} : vector<8x1xi32>
    %c8_i32 = arith.constant 8 : i32
    %26 = arith.muli %24, %c8_i32 : i32
    %27 = vector.broadcast %26 : i32 to vector<8x1xi32>
    %28 = arith.addi %25, %27 : vector<8x1xi32>
    %c8_i32_7 = arith.constant 8 : i32
    %29 = vector.broadcast %c8_i32_7 : i32 to vector<8x1xi32>
    %30 = arith.cmpi slt, %28, %29 : vector<8x1xi32>
    %cst_8 = arith.constant 0.000000e+00 : f32
    %31 = vector.broadcast %cst_8 : f32 to vector<8x1xf32>
    %32 = arith.select %30, %22, %31 : vector<8x1xi1>, vector<8x1xf32>
    %c0_9 = arith.constant 0 : index
    %c0_10 = arith.constant 0 : index
    %33 = vector.load %arg5[%c0_9, %c0_10] : memref<1x1xf32, #tpu.memory_space<vmem>>, vector<1x1xf32>
    %cst_11 = arith.constant dense<0.000000e+00> : vector<1xf32>
    %34 = vector.multi_reduction <add>, %32, %cst_11 [0] : vector<8x1xf32> to vector<1xf32>
    %35 = vector.shape_cast %34 : vector<1xf32> to vector<1x1xf32>
    %36 = arith.addf %33, %35 : vector<1x1xf32>
    %c0_12 = arith.constant 0 : index
    %c0_13 = arith.constant 0 : index
    %37 = vector.load %arg5[%c0_12, %c0_13] : memref<1x1xf32, #tpu.memory_space<vmem>>, vector<1x1xf32>
    tpu.vector_store %arg5[%c0_12, %c0_13], %36 {strides = array<i32>} : memref<1x1xf32, #tpu.memory_space<vmem>>, vector<1x1xf32>,
    %c0_i32_14 = arith.constant 0 : i32
    %38 = arith.cmpi eq, %arg1, %c0_i32_14 : i32
    %39 = arith.extui %38 : i1 to i32
    %c0_i32_15 = arith.constant 0 : i32
    %40 = arith.cmpi ne, %39, %c0_i32_15 : i32
    scf.if %40 {
      %c0_16 = arith.constant 0 : index
      %c0_17 = arith.constant 0 : index
      %41 = vector.load %arg5[%c0_16, %c0_17] : memref<1x1xf32, #tpu.memory_space<vmem>>, vector<1x1xf32>
      %42 = vector.shape_cast %41 : vector<1x1xf32> to vector<1x1xf32>
      %43 = vector.broadcast %42 : vector<1x1xf32> to vector<8x128xf32>
      %c0_18 = arith.constant 0 : index
      %c0_19 = arith.constant 0 : index
      %44 = vector.load %arg4[%c0_18, %c0_19] : memref<8x128xf32, #tpu.memory_space<vmem>>, vector<8x128xf32>
      tpu.vector_store %arg4[%c0_18, %c0_19], %43 {strides = array<i32>} : memref<8x128xf32, #tpu.memory_space<vmem>>, vector<8x128xf32>,
    } else {
    }
    return
  }
  func.func @transform_0(%arg0: i32, %arg1: i32) -> (i32, i32) {
    %c1_i32 = arith.constant 1 : i32
    %0 = arith.muli %arg0, %c1_i32 : i32
    %1 = arith.addi %0, %arg1 : i32
    %c1_i32_0 = arith.constant 1 : i32
    %c0_i32 = arith.constant 0 : i32
    %2 = arith.cmpi eq, %c1_i32_0, %c0_i32 : i32
    %c1_i32_1 = arith.constant 1 : i32
    %3 = arith.select %2, %c1_i32_1, %c1_i32_0 : i32
    %4 = arith.remsi %1, %3 : i32
    %c0_i32_2 = arith.constant 0 : i32
    %5 = arith.cmpi ne, %4, %c0_i32_2 : i32
    %c0_i32_3 = arith.constant 0 : i32
    %6 = arith.cmpi slt, %4, %c0_i32_3 : i32
    %c0_i32_4 = arith.constant 0 : i32
    %7 = arith.cmpi slt, %3, %c0_i32_4 : i32
    %8 = arith.xori %6, %7 : i1
    %9 = arith.andi %8, %5 : i1
    %10 = arith.addi %4, %3 : i32
    %11 = arith.select %9, %10, %4 : i32
    %c0_i32_5 = arith.constant 0 : i32
    %c0_i32_6 = arith.constant 0 : i32
    return %11, %c0_i32_5 : i32, i32
  }
  func.func @transform_1(%arg0: i32, %arg1: i32) -> (i32, i32) {
    %c1_i32 = arith.constant 1 : i32
    %0 = arith.muli %arg0, %c1_i32 : i32
    %1 = arith.addi %0, %arg1 : i32
    %c1_i32_0 = arith.constant 1 : i32
    %c0_i32 = arith.constant 0 : i32
    %2 = arith.cmpi eq, %c1_i32_0, %c0_i32 : i32
    %c1_i32_1 = arith.constant 1 : i32
    %3 = arith.select %2, %c1_i32_1, %c1_i32_0 : i32
    %4 = arith.remsi %1, %3 : i32
    %c0_i32_2 = arith.constant 0 : i32
    %5 = arith.cmpi ne, %4, %c0_i32_2 : i32
    %c0_i32_3 = arith.constant 0 : i32
    %6 = arith.cmpi slt, %4, %c0_i32_3 : i32
    %c0_i32_4 = arith.constant 0 : i32
    %7 = arith.cmpi slt, %3, %c0_i32_4 : i32
    %8 = arith.xori %6, %7 : i1
    %9 = arith.andi %8, %5 : i1
    %10 = arith.addi %4, %3 : i32
    %11 = arith.select %9, %10, %4 : i32
    %c0_i32_5 = arith.constant 0 : i32
    %c0_i32_6 = arith.constant 0 : i32
    return %11, %c0_i32_5 : i32, i32
  }
  func.func @transform_2(%arg0: i32, %arg1: i32) -> (i32, i32) {
    %c0_i32 = arith.constant 0 : i32
    %c0_i32_0 = arith.constant 0 : i32
    return %arg0, %c0_i32 : i32, i32
  }
}

</mosaic_0001>

<bundles_post_ra>
// kernel: tpu_custom_call.1
= control target key start
LH: loop header
LB: loop body
LE: loop exit
PB: predicated region body
PF: predicated region fallthrough
CT: control target
= control target key end

     0   :  { %vm20_vm0 = vcmask 261120   ;;  %s157_s0 = inlined_call_operand.vmem [shape: f32[8,32], index: 0, kind: input, shape index: {}]   ;;  %s158_s1 = inlined_call_operand.vmem [shape: s32[8,1], index: 1, kind: input, shape index: {}]   ;;  %s159_s2 = inlined_call_operand.hbm [shape: f32[8,128], index: 2, kind: output, shape index: {}]  }
   0x1   :  { %v18_v0 = vld [vmem:[%s157_s0] sm:$0xff] }
   0x2   :  { %7 = vsyncpa [#allocation4], 0  ;;  %v21_v1 = vsel %vm20_vm0, %v18_v0, -inf  ;;  %v125_v2 = vmov 0   ;;  %v19_v3 = vld [vmem:[%s158_s1] sm:$0xff]  ;;  %v33_v9 = vlaneseq  ;;  %vm16_vm2 = vcmask 0  }
   0x3   :  { %92 = vset.pattern.permute.xlu0 %v125_v2  ;;  %93 = vset.pattern.permute.xlu2 %v125_v2  ;;  %v126_v14 = vmov 0.0   ;;  %s127_s0 = smov [#allocation3]   ;;  %s80_s15 = sshll.u32 %s159_s2, 4  ;;  %s81_s15 = int_to_ptr.hbm [resolvable:$true] %s80_s15 }
   0x4   :  { %22 = vmax.xlane.f32.xlu0 %v21_v1  ;;  %v34_v10 = vand.u32 127, %v33_v9  ;;  %17 = vst.msk [vmem:[#allocation2] sm:$0x1] %vm16_vm2, %v126_v14  ;;  %s78_s1 = sshll.u32 %s127_s0, 4  ;;  %s79_s1 = int_to_ptr.vmem [resolvable:$true] %s78_s1 }
   0xb   :  { %v52_v26 = vld [vmem:[#allocation2] sm:$0x1] }
  0x18   :  { %36 = vperm.xlu0 %92, %v19_v3  }
  0x77   :  { %v23_v4 = vpop.xlane.xlu0 %22 }
  0x78   :  { %v24_v5 = vsub.f32 %v18_v0, %v23_v4 }
  0x7a   :  { %v25_v6 = vmul.f32 1.442695, %v24_v5 }
  0x7c   :  { %95 = vpow2.f32 %v25_v6 }
  0x82   :  { %v96_v7 = vpop.eup %95 }
  0x83   :  { %v27_v8 = vsel %vm20_vm0, %v96_v7, 0.0 }
  0x84   :  { %28 = vadd.xlane.f32.xlu1 %v27_v8 }
  0x8a   :  { %v37_v11 = vpop.permute.xlu0 %36 }
  0x8b   :  { %vm38_vm1 = vcmp.eq.s32.totalorder %v34_v10, %v37_v11 }
  0x8c   :  { %v39_v12 = vsel %vm38_vm1, %v18_v0, 0.0 }
  0x8d   :  { %v40_v13 = vsel %vm20_vm0, %v39_v12, 0.0 }
  0x8e   :  { %41 = vadd.xlane.f32.xlu1 %v40_v13 }
  0xf7   :  { %v29_v15 = vpop.xlane.xlu1 %28 }
  0xf8   :  { %97 = vlog2.f32 %v29_v15 }
  0xfe   :  { %v98_v16 = vpop.eup %97 }
  0xff   :  { %v31_v17 = vmul.f32 0.6931472, %v98_v16 }
 0x101   :  { %v32_v18 = vadd.f32 %v31_v17, %v23_v4  ;;  %v42_v19 = vpop.xlane.xlu1 %41 }
 0x103   :  { %v43_v20 = vsub.f32 %v32_v18, %v42_v19 }
 0x105   :  { %v53_v21 = vrot.slane %v43_v20, 4 }
 0x107   :  { %v54_v22 = vadd.f32 %v53_v21, %v43_v20 }
 0x109   :  { %v55_v23 = vrot.slane %v54_v22, 2 }
 0x10b   :  { %v56_v24 = vadd.f32 %v55_v23, %v54_v22 }
 0x10d   :  { %v57_v25 = vrot.slane %v56_v24, 1 }
 0x10f   :  { %v58_v27 = vadd.f32 %v57_v25, %v56_v24 }
 0x111   :  { %v59_v28 = vadd.f32 %v58_v27, %v52_v26 }
 0x113   :  { %61 = vst.msk [vmem:[#allocation2] sm:$0x1] %vm16_vm2, %v59_v28 }
 0x11a   :  { %v94_v29 = vld [vmem:[#allocation2] ss:$0 sm:$0xff] }
 0x11b   :  { %69 = vperm.xlu2 %93, %v94_v29  }
 0x175   :  { %v70_v30 = vpop.permute.xlu2 %69 }
 0x176   :  { %72 = vst [vmem:[#allocation3] sm:$0xff] %v70_v30 }
 0x177   :  { %83 = dma.vmem_to_hbm [thread:$0]  %s79_s1, 128, %s81_s15, [#allocation4]  }
 0x178   :  { %123 = dma.done.wait [#allocation4], 128  }
 0x179   :  { %124 = vsyncadd [#allocation4], 4294967168 }
 0x17a   :  { %88 = vsyncpa [#allocation4], 1 }

</bundles_post_ra>
